<compile_context>
chip_gen: v7x
topology: tpu7x:2x2x1
jax: 0.10.0
libtpu: 0.0.40
codegen_flags: <defaults>
</compile_context>

<pallas_src>
import jax
import jax.numpy as jnp
from jax import lax
from jax.experimental import pallas as pl
from jax.experimental.pallas import tpu as pltpu


def _head_kernel(x_ref, o_ref):
    # x_ref / o_ref: (T, tc) — one batch element, one lane tile of channels.
    T = x_ref.shape[0]
    # Synthesize causal-average weights in-kernel: w[i, j] = 1/(i+1) if j <= i
    # else 0.  Built in f32 (v5e has no bf16 VPU), cast to x's dtype only for
    # the MXU feed; accumulation stays f32 via preferred_element_type.
    row = lax.broadcasted_iota(jnp.int32, (T, T), 0)
    col = lax.broadcasted_iota(jnp.int32, (T, T), 1)
    inv_row = pl.reciprocal((row + 1).astype(jnp.float32), approx=False)
    w = jnp.where(col <= row, inv_row, 0.0).astype(x_ref.dtype)
    o_ref[...] = jnp.dot(
        w, x_ref[...], preferred_element_type=jnp.float32
    ).astype(o_ref.dtype)


def make_head_weights(context_size: int) -> jnp.ndarray:
    """Deterministic buffer identical to the PyTorch module's `weights` (for reference)."""
    tril = jnp.tril(jnp.ones((context_size, context_size), dtype=jnp.float32))
    logits = jnp.where(tril == 0, -jnp.inf, 0.0)
    return jax.nn.softmax(logits, axis=-1)  # rows: 1/(i+1) on the causal prefix


def _pick_c_tile(T: int, C: int, itemsize: int, vmem_budget_bytes: int) -> int:
    """VMEM-budget-driven channel (lane) tile.

    Per grid step we need: in-kernel weights/mask temporaries (~3*T*T*4 bytes)
    plus the double-buffered (T, tc) input and output tiles.  Pick the largest
    tc that fits the budget, rounded down to a multiple of 128, clamped to C.
    """
    fixed = 3 * T * T * 4                       # weights + mask temporaries (f32)
    per_lane = 4 * T * max(itemsize, 4)         # in + out, x2 pipeline buffers
    avail = max(vmem_budget_bytes - fixed, 128 * per_lane)
    max_tc = avail // per_lane
    if C <= max_tc:
        return C                                # full extent -> single lane tile
    return max(128, int(max_tc // 128) * 128)


def head_forward(x: jnp.ndarray, *, interpret: bool = False) -> jnp.ndarray:
    """x: (B, T, C) -> (B, T, C); matches torch `weights.matmul(x)`."""
    B, T, C = x.shape
    itemsize = jnp.dtype(x.dtype).itemsize

    # Stay comfortably inside v7x's 64 MiB physical VMEM (leaving compiler
    # scratch headroom); this also keeps v5e/v6e well below their limits.
    vmem_budget = 48 << 20
    tc = _pick_c_tile(T, C, itemsize, vmem_budget)
    grid = (B, pl.cdiv(C, tc))

    footprint = 3 * T * T * 4 + 4 * T * tc * max(itemsize, 4) + (4 << 20)
    vmem_limit = int(min(64 << 20, max(16 << 20, footprint)))

    # Weights are synthesized in-kernel: HBM traffic is just x in + out.
    bytes_accessed = 2 * B * T * C * itemsize

    return pl.pallas_call(
        _head_kernel,
        out_shape=jax.ShapeDtypeStruct((B, T, C), x.dtype),
        grid_spec=pltpu.PrefetchScalarGridSpec(
            num_scalar_prefetch=0,
            grid=grid,
            in_specs=[
                # Batch dim squeezed (size-1 block), full T rows, one lane tile
                # of channels in x's native layout (no wrapper transposes).
                pl.BlockSpec((None, T, tc), lambda b, c: (b, 0, c)),
            ],
            out_specs=pl.BlockSpec((None, T, tc), lambda b, c: (b, 0, c)),
        ),
        compiler_params=pltpu.CompilerParams(
            # Batch and channel tiles are independent -> shard across the two
            # TensorCores on v7x; harmless on single-TC v5e/v6e.
            dimension_semantics=("parallel", "parallel"),
            vmem_limit_bytes=vmem_limit,
        ),
        cost_estimate=pl.CostEstimate(
            flops=2 * T * T * B * C,
            transcendentals=0,
            bytes_accessed=int(bytes_accessed),
        ),
        interpret=interpret,
    )(x)


if __name__ == "__main__":
    # Small shapes consistent with the module: batch=2, context_size=8, channels=32
    B, T, C = 2, 8, 32
    key = jax.random.PRNGKey(0)
    x = jax.random.normal(key, (B, T, C), dtype=jnp.float32)

    out = jax.block_until_ready(head_forward(x))

    # Reference check against plain JAX (same math as torch: weights @ x)
    weights = make_head_weights(T)
    ref = jnp.einsum("tk,bkc->btc", weights, x)
    assert out.shape == (B, T, C)
    assert jnp.allclose(out, ref, atol=1e-5, rtol=1e-5), "mismatch vs reference"

    print("KERNEL_OK")
</pallas_src>

<mosaic_0001>
module attributes {stable_mosaic.version = 11 : i64} {
  func.func @_head_kernel(%arg0: i32, %arg1: i32, %arg2: memref<1x8x32xf32, #tpu.memory_space<vmem>>, %arg3: memref<1x8x32xf32, #tpu.memory_space<vmem>>) attributes {dimension_semantics = [#tpu.dimension_semantics<parallel>, #tpu.dimension_semantics<parallel>], iteration_bounds = array<i64: 2, 1>, scalar_prefetch = 0 : i64, scratch_operands = 0 : i64, tpu.core_type = #tpu.core_type<tc>, window_params = [{transform_indices = @transform_0, window_bounds = array<i64: 1, 8, 32>}, {transform_indices = @transform_1, window_bounds = array<i64: 1, 8, 32>}]} {
    %0 = tpu.iota {dimensions = array<i32: 0>} : vector<8x8xi32>
    %1 = tpu.iota {dimensions = array<i32: 1>} : vector<8x8xi32>
    %c1_i32 = arith.constant 1 : i32
    %2 = vector.broadcast %c1_i32 : i32 to vector<8x8xi32>
    %3 = arith.addi %0, %2 : vector<8x8xi32>
    %4 = arith.sitofp %3 : vector<8x8xi32> to vector<8x8xf32>
    %5 = tpu.reciprocal %4 : vector<8x8xf32> -> vector<8x8xf32>
    %6 = arith.cmpi sle, %1, %0 : vector<8x8xi32>
    %cst = arith.constant 0.000000e+00 : f32
    %7 = vector.broadcast %cst : f32 to vector<8x8xf32>
    %8 = arith.select %6, %5, %7 : vector<8x8xi1>, vector<8x8xf32>
    %c0 = arith.constant 0 : index
    %c0_0 = arith.constant 0 : index
    %c0_1 = arith.constant 0 : index
    %9 = vector.load %arg2[%c0, %c0_0, %c0_1] : memref<1x8x32xf32, #tpu.memory_space<vmem>>, vector<1x8x32xf32>
    %10 = vector.shape_cast %9 : vector<1x8x32xf32> to vector<8x32xf32>
    %cst_2 = arith.constant dense<0.000000e+00> : vector<8x32xf32>
    %11 = tpu.matmul %8, %10, %cst_2 {dimension_numbers = #tpu.dot_dimension_numbers<[1], [0], [0], [1], [0, 0, 1, 1], [], []>} : vector<8x8xf32>, vector<8x32xf32>, vector<8x32xf32> -> vector<8x32xf32>
    %c0_3 = arith.constant 0 : index
    %c0_4 = arith.constant 0 : index
    %c0_5 = arith.constant 0 : index
    %12 = vector.load %arg3[%c0_3, %c0_4, %c0_5] : memref<1x8x32xf32, #tpu.memory_space<vmem>>, vector<1x8x32xf32>
    %13 = vector.shape_cast %12 : vector<1x8x32xf32> to vector<8x32xf32>
    %14 = vector.shape_cast %11 : vector<8x32xf32> to vector<1x8x32xf32>
    tpu.vector_store %arg3[%c0_3, %c0_4, %c0_5], %14 {strides = array<i32>} : memref<1x8x32xf32, #tpu.memory_space<vmem>>, vector<1x8x32xf32>,
    return
  }
  func.func @transform_0(%arg0: i32, %arg1: i32) -> (i32, i32, i32) {
    %c0_i32 = arith.constant 0 : i32
    %c0_i32_0 = arith.constant 0 : i32
    return %arg0, %c0_i32, %arg1 : i32, i32, i32
  }
  func.func @transform_1(%arg0: i32, %arg1: i32) -> (i32, i32, i32) {
    %c0_i32 = arith.constant 0 : i32
    %c0_i32_0 = arith.constant 0 : i32
    return %arg0, %c0_i32, %arg1 : i32, i32, i32
  }
}

</mosaic_0001>

<bundles_post_ra>
// kernel: tpu_custom_call.1
= control target key start
LH: loop header
LB: loop body
LE: loop exit
PB: predicated region body
PF: predicated region fallthrough
CT: control target
= control target key end

     0   :  { %6 = vsyncpa [#allocation3], 0  ;;  %s717_s0 = inlined_call_operand.hbm [shape: f32[2,8,32], index: 0, kind: input, shape index: {}]   ;;  %s718_s1 = inlined_call_operand.hbm [shape: f32[2,8,32], index: 1, kind: output, shape index: {}]  }
   0x1   :  { %8 = vsyncpa [#allocation3 + $0x1], 0 }
   0x2   :  { %9 = vsyncpa [#allocation4], 0 }
   0x3   :  { %11 = vsyncpa [#allocation4 + $0x1], 0  ;;  %s545_s6 = smov 0   ;;  %s547_s7 = smov 0  }
   0x4   :  { %s549_s8 = smov 0   ;;  %s551_s9 = smov 0  }
   0x5   :  { %s553_s10 = smov 0   ;;  %s555_s11 = smov 0  }
   0x6 LB: > { %s330_s12 = sadd.s32 4294967295, %s529_s11   ;;  %s331_s13 = sadd.s32 4294967294, %s529_s11   ;;  %s529_s11 = sphi %s555_s11, %s17_s11   ;;  %s525_s10 = sphi %s553_s10, %s734_s10   ;;  %s521_s9 = sphi %s551_s9, %s733_s9   ;;  %s517_s8 = sphi %s549_s8, %s732_s8   ;;  %s513_s7 = sphi %s547_s7, %s731_s7   ;;  %s509_s6 = sphi %s545_s6, %s730_s6  }
   0x7   : > { %s29_s14 = sadd.s32 1, %s525_s10  ;;  %s38_s15 = sadd.s32 1, %s517_s8 }
   0x8   : > { %p31_p0 = scmp.ge.s32.totalorder %s29_s14, 2  ;;  %p45_p1 = scmp.ne.s32.totalorder %s517_s8, %s513_s7 }
   0x9   : > { %p46_p2 = scmp.eq.s32.totalorder %s529_s11, 0  ;;  %p51_p3 = scmp.ne.s32.totalorder %s513_s7, %s509_s6 }
   0xa   : > { %s736_s14 = smov (%p31_p0, %s29_s14), 0  ;;  %p52_p5 = scmp.eq.s32.totalorder %s330_s12, 0 }
   0xb   : > { %p586_p4 = por %p46_p2, %p45_p1  ;;  %s33_s17 = ssub.s32 %s525_s10, %s736_s14 }
   0xc   : > { %p77_p6 = scmp.eq.s32.totalorder %s330_s12, 1  ;;  %p36_p7 = scmp.eq.s32.totalorder %s33_s17, 0 }
   0xd   : > { %p592_p8 = por %p52_p5, %p51_p3  ;;  %p83_p10 = scmp.eq.s32.totalorder %s331_s13, 1 }
   0xe   : > { %p596_p9 = por %p77_p6, %p45_p1  ;;  %p363_p13 = scmp.lt.s32.totalorder %s529_s11, 2 }
   0xf   : > { %s601_s20 = scalar_select %p36_p7, %s517_s8, %s38_s15  }
  0x10   : > { %s722_s19 = scalar_select %p596_p9, 1, 0 }
  0x11   : > { %p603_p11 = por %p83_p10, %p51_p3  ;;  %s103_s22 = sand.u32 1, %s517_s8  }
  0x12   : > { %s334_s23 = sshll.u32 %s103_s22, 3  ;;  %s335_s24 = sshll.u32 %s525_s10, 7 }
  0x13   : > { %s723_s21 = scalar_select %p603_p11, 1, 0 }
  0x14   : > { %s614_s27 = scalar_lea.hbm %s717_s0, %s335_s24  ;;  %s107_s28 = scalar_lea.vmem [#allocation2], %s334_s23 }
  0x15   : > { %s115_s29 = sshll.u32 %s107_s28, 4  ;;  %p620_p0 = pnand %p363_p13, %p586_p4  ;;  %s616_s29 = int_to_ptr.vmem [resolvable:$true] %s115_s29 }
  0x16   : > { %s104_s2 = scalar_lea.sflag [#allocation3], %s103_s22  ;;  %s417_s3 = scalar_lea.hbm %s614_s27, 128 }
  0x17   : > { %p418_p3 = scmp.ne.s32.totalorder %s614_s27, %s417_s3  ;;  %p419_p5 = pneg %p620_p0 }
  0x18   : > { %s422_s12 = scalar_lea.hbm %s717_s0, 256  ;;  %p423_p4 = scmp.lt.u32.totalorder %s614_s27, %s717_s0 }
  0x19   : > { %p420_p6 = pnand %p419_p5, %p418_p3  ;;  %p424_p10 = scmp.lt.u32.totalorder %s422_s12, %s417_s3 }
  0x1a   : > { %p426_p12 = scmp.lt.u32.totalorder %s417_s3, %s614_s27 }
  0x1b   : > { %p421_p7 = pneg %p420_p6  ;;  %p425_p13 = por %p424_p10, %p423_p4 }
  0x1d   : > { %p427_p1 = por %p426_p12, %p425_p13 }
  0x1f   : > { %p428_p2 = pnand %p427_p1, %p421_p7 }
  0x21   : > { %431 = shalt.err (!%p428_p2)
}
  0x22   : > { %s432_s16 = scalar_lea.vmem %s616_s29, 128  ;;  %s531_s17 = smov [#allocation2]  }
  0x23   : > { %p433_p3 = scmp.ne.s32.totalorder %s616_s29, %s432_s16  ;;  %s437_s22 = sshll.u32 %s531_s17, 4  ;;  %s438_s22 = int_to_ptr.vmem [resolvable:$false] %s437_s22 }
  0x24   : > { %s439_s23 = scalar_lea.vmem %s438_s22, 256  ;;  %p440_p9 = scmp.lt.s32.totalorder %s616_s29, %s438_s22 }
  0x25   : > { %p435_p6 = pnand %p433_p3, %p419_p5  ;;  %p441_p4 = scmp.lt.s32.totalorder %s439_s23, %s432_s16 }
  0x27   : > { %p436_p11 = pneg %p435_p6  ;;  %p442_p10 = por %p441_p4, %p440_p9 }
  0x29   : > { %p443_p12 = pnand %p442_p10, %p436_p11 }
  0x2b   : > { %446 = shalt.err (!%p443_p12)
}
  0x2c   : > { %358 = dma.hbm_to_vmem [thread:$0]  (!%p620_p0), %s614_s27, 128, %s616_s29, %s104_s2  }
  0x2d   : > { %p725_p1 = scmp.lt.s32.totalorder %s529_s11, 3  ;;  %p726_p2 = scmp.ge.s32.totalorder %s529_s11, 1 }
  0x2f   : > { %p121_p5 = pnand %p726_p2, %p725_p1 }
  0x30   : > { %s656_s24 = sand.u32 (!%p121_p5), 1, %s513_s7  }
  0x31   : > { %124 = sbr.rel (%p121_p5) target bundleno = 303 (0x12f), region = 24  ;;  %s337_s25 = sshll.u32 (!%p121_p5), %s656_s24, 3 }
  0x32   : > { %s127_s26 = scalar_lea.sflag (!%p121_p5), [#allocation3], %s656_s24  ;;  %s130_s28 = scalar_lea.vmem (!%p121_p5), [#allocation2], %s337_s25 }
  0x38   : > { %500 = dma.done.wait (%p592_p8), %s127_s26, 128  }
  0x39   : > { %502 = vsyncadd (%p592_p8), %s127_s26, 4294967168  ;;  %v149_v0 = vlaneseq  ;;  %v532_v1 = vmov 0.0   ;;  %vm533_vm0 = vmmov 0   ;;  %v158_v5 = vld [vmem:[%s130_s28] sm:$0xff]  ;;  %vm159_vm2 = vcmask 64512   ;;  %s341_s18 = sshll.u32 %s521_s9, 7 }
  0x3a   : > { %346 = vmatprep.subr.mxu0 %v532_v1  ;;  %348 = vmatprep.mubr.msk.f32.mxu0 %vm533_vm0, %v532_v1  ;;  %s148_s27 = scalar_lea.vmem [#allocation5], %s337_s25  ;;  %vm233_vm3 = vcmask 261120   ;;  %s668_s3 = scalar_lea.hbm %s718_s1, %s341_s18 }
  0x3b   : > { %v150_v2 = vshrl.u32 %v149_v0, 7  ;;  %347 = vmatpush3.msra.mxu0 %v158_v5  ;;  %v152_v6 = vand.u32 127, %v149_v0  ;;  %s250_s29 = sshll.u32 %s148_s27, 4  ;;  %s236_s4 = scalar_lea.sflag [#allocation4], %s656_s24  ;;  %s670_s29 = int_to_ptr.vmem [resolvable:$true] %s250_s29 }
  0x3c   : > { %s447_s5 = scalar_lea.vmem %s670_s29, 128  ;;  %p727_p9 = scmp.ne.s32.totalorder %s722_s19, 0 }
  0x3d   : > { %v153_v3 = vadd.s32 1, %v150_v2  ;;  %vm156_vm1 = vcmp.le.s32.totalorder %v152_v6, %v150_v2  ;;  %p448_p8 = scmp.ne.s32.totalorder %s670_s29, %s447_s5  ;;  %s534_s9 = smov [#allocation5]  }
  0x3e   : > { %s451_s12 = sshll.u32 %s534_s9, 4  ;;  %s452_s12 = int_to_ptr.vmem [resolvable:$false] %s451_s12 }
  0x3f   : > { %v154_v4 = vcvt.s32.f32 %v153_v3  ;;  %p449_p11 = pnand %p448_p8, %p727_p9  ;;  %s453_s13 = scalar_lea.vmem %s452_s12, 256 }
  0x40   : > { %p454_p7 = scmp.lt.s32.totalorder %s670_s29, %s452_s12  ;;  %p455_p13 = scmp.lt.s32.totalorder %s453_s13, %s447_s5 }
  0x41   : > { %415 = vrcp.f32 %v154_v4  ;;  %p450_p0 = pneg %p449_p11 }
  0x42   : > { %p456_p3 = por %p455_p13, %p454_p7 }
  0x44   : > { %p457_p6 = pnand %p456_p3, %p450_p0 }
  0x4b   : > { %v416_v7 = vpop.eup %415 }
  0x4c   : > { %v157_v8 = vsel %vm156_vm1, %v416_v7, 0.0 }
  0x4d   : > { %349 = vmatmul.mubr.msk.f32.vlgmr.msra.gmra.mrb[0].mxu0 %vm159_vm2, %v157_v8 }
 0x120   : > { %v229_v9 = vpop.f32.mrb[0].mxu0 }
 0x121   : > { %234 = vst.msk [vmem:[%s148_s27] sm:$0xff] %vm233_vm3, %v229_v9  ;;  %v350_v10 = vpop.f32.mrb[1].mxu0 }
 0x122   : > { %460 = shalt.err (!%p457_p6)
}
 0x123   : > { %s461_s15 = scalar_lea.hbm %s668_s3, 128  ;;  %s465_s22 = scalar_lea.hbm %s718_s1, 256 }
 0x124   : > { %p462_p4 = scmp.ne.s32.totalorder %s668_s3, %s461_s15  ;;  %p466_p1 = scmp.lt.u32.totalorder %s668_s3, %s718_s1 }
 0x125   : > { %p467_p2 = scmp.lt.u32.totalorder %s465_s22, %s461_s15  ;;  %p469_p8 = scmp.lt.u32.totalorder %s461_s15, %s668_s3 }
 0x126   : > { %p463_p10 = pnand %p462_p4, %p727_p9 }
 0x127   : > { %p468_p5 = por %p467_p2, %p466_p1 }
 0x128   : > { %p464_p12 = pneg %p463_p10 }
 0x129   : > { %p470_p11 = por %p469_p8, %p468_p5 }
 0x12b   : > { %p471_p0 = pnand %p470_p11, %p464_p12 }
 0x12d   : > { %474 = shalt.err (!%p471_p0)
}
 0x12e   : > { %353 = dma.vmem_to_hbm [thread:$0]  (%p727_p9), %s670_s29, 128, %s668_s3, %s236_s4  }
 0x12f PF: > { %s262_s25 = sand.u32 1, %s509_s6   ;;  %p728_p7 = scmp.ne.s32.totalorder %s723_s21, 0 }
 0x130   : > { %p729_p13 = scmp.ge.s32.totalorder %s529_s11, 2  ;;  %s263_s26 = scalar_lea.sflag [#allocation4], %s262_s25 }
 0x132   : > { %p360_p3 = pnand %p729_p13, %p728_p7 }
 0x134   : > { %504 = dma.done.wait (!%p360_p3), %s263_s26, 128  }
 0x135   : > { %506 = vsyncadd (!%p360_p3), %s263_s26, 4294967168  ;;  %s17_s11 = sadd.s32 1, %s529_s11   ;;  %s730_s6 = smov %s513_s7 }
 0x136   : > { %p14_p6 = scmp.ge.s32.totalorder %s17_s11, 4   ;;  %s731_s7 = smov %s517_s8 }
 0x137   : > { %s732_s8 = smov %s601_s20  ;;  %s733_s9 = smov %s525_s10 }
 0x138   : > { %s734_s10 = smov %s736_s14  ;;  %16 = sbr.rel (!%p14_p6) target bundleno = 6 (0x6), region = 69 }
 0x13f   :  { %268 = vsyncpa [#allocation3], 1 }
 0x140   :  { %270 = vsyncpa [#allocation3 + $0x1], 1 }
 0x141   :  { %271 = vsyncpa [#allocation4], 1 }
 0x142   :  { %273 = vsyncpa [#allocation4 + $0x1], 1 }

</bundles_post_ra>
